<compile_context>
chip_gen: v7x
topology: tpu7x:2x2x1
jax: 0.10.0
libtpu: 0.0.40
codegen_flags: <defaults>
</compile_context>

<pallas_src>
import jax
import jax.numpy as jnp
from jax.experimental import pallas as pl
from jax.experimental.pallas import tpu as pltpu


def _contract(a, b):
    # (BB, tm, tk) x (BB, tk, tn) -> (BB, tm, tn), fp32 accumulation on the MXU.
    return jax.lax.dot_general(
        a,
        b,
        dimension_numbers=(((2,), (1,)), ((0,), (0,))),
        preferred_element_type=jnp.float32,
    )


def _bmm_kernel_single_k(a_ref, b_ref, o_ref):
    # K fits in one tile: no accumulator needed, write the result directly.
    o_ref[...] = _contract(a_ref[...], b_ref[...]).astype(o_ref.dtype)


def _bmm_kernel_multi_k(a_ref, b_ref, o_ref, acc_ref):
    # a_ref: (BB, tm, tk), b_ref: (BB, tk, tn), o_ref/acc_ref: (BB, tm, tn)
    k_idx = pl.program_id(3)

    @pl.when(k_idx == 0)
    def _():
        acc_ref[...] = jnp.zeros_like(acc_ref)

    acc_ref[...] += _contract(a_ref[...], b_ref[...])

    @pl.when(k_idx == pl.num_programs(3) - 1)
    def _():
        o_ref[...] = acc_ref[...].astype(o_ref.dtype)


def _pick_tile(dim: int, candidates) -> int:
    """Largest candidate that evenly divides `dim`, else the full extent."""
    for c in candidates:
        if dim % c == 0:
            return c
    return dim


def batched_matmul(A: jax.Array, B: jax.Array) -> jax.Array:
    """Batched matmul matching the CUDA reference kernel semantics."""
    assert A.ndim == 3 and B.ndim == 3
    batch, m, k = A.shape
    batch_b, k_b, n = B.shape
    assert batch == batch_b and k == k_b

    out_dtype = A.dtype
    in_bytes = jnp.dtype(A.dtype).itemsize
    out_bytes = jnp.dtype(out_dtype).itemsize

    # --- tile selection ------------------------------------------------------
    # tm: second-minor dim of A/C blocks -> multiple of 8 (or full extent).
    # tn: minor dim of B/C blocks        -> multiple of 128 (or full extent).
    # tk: minor dim of A / second-minor of B -> multiple of 128 (or full extent).
    tm = _pick_tile(m, (256, 128, 64, 32, 16, 8))
    tn = _pick_tile(n, (512, 256, 128))
    tk = _pick_tile(k, (512, 256, 128))

    # --- batch blocking (amortize per-step overhead, enlarge DMAs) -----------
    # Steady-state VMEM per batch element:
    #   2x double-buffered A and B input tiles, 2x double-buffered C output
    #   tile, plus one fp32 accumulator tile (only when K is tiled).
    nk = k // tk
    acc_bytes = (4 * tm * tn) if nk > 1 else 0
    per_elem_vmem = (
        in_bytes * 2 * (tm * tk + tk * tn) + out_bytes * 2 * tm * tn + acc_bytes
    )
    budget_bytes = 24 * 1024 * 1024  # well under the 48 MiB limit set below
    bb = 1
    for cand in (64, 32, 16, 8, 4, 2, 1):
        if batch % cand == 0 and cand * per_elem_vmem <= budget_bytes:
            bb = cand
            break

    grid = (batch // bb, m // tm, n // tn, nk)

    if nk == 1:
        kernel = _bmm_kernel_single_k
        scratch_shapes = []
    else:
        kernel = _bmm_kernel_multi_k
        scratch_shapes = [pltpu.VMEM((bb, tm, tn), jnp.float32)]

    grid_spec = pltpu.PrefetchScalarGridSpec(
        num_scalar_prefetch=0,
        grid=grid,
        in_specs=[
            pl.BlockSpec((bb, tm, tk), lambda b, i, j, kk: (b, i, kk)),
            pl.BlockSpec((bb, tk, tn), lambda b, i, j, kk: (b, kk, j)),
        ],
        out_specs=pl.BlockSpec((bb, tm, tn), lambda b, i, j, kk: (b, i, j)),
        scratch_shapes=scratch_shapes,
    )

    cost = pl.CostEstimate(
        flops=2 * batch * m * k * n,
        transcendentals=0,
        bytes_accessed=in_bytes * batch * (m * k + k * n)
        + out_bytes * batch * m * n,
    )

    return pl.pallas_call(
        kernel,
        out_shape=jax.ShapeDtypeStruct((batch, m, n), out_dtype),
        grid_spec=grid_spec,
        compiler_params=pltpu.CompilerParams(
            dimension_semantics=("parallel", "parallel", "parallel", "arbitrary"),
            vmem_limit_bytes=48 * 1024 * 1024,
        ),
        cost_estimate=cost,
    )(A, B)


class ModelNew:
    """JAX/Pallas equivalent of the PyTorch ModelNew (no parameters)."""

    def __call__(self, A: jax.Array, B: jax.Array) -> jax.Array:
        return batched_matmul(A, B)


if __name__ == "__main__":
    key = jax.random.PRNGKey(0)
    k_a, k_b = jax.random.split(key)

    batch, m, k, n = 2, 64, 32, 128
    A = jax.random.normal(k_a, (batch, m, k), dtype=jnp.float32)
    B = jax.random.normal(k_b, (batch, k, n), dtype=jnp.float32)

    model = ModelNew()
    C = model(A, B)
    C = jax.block_until_ready(C)

    # Correctness check against plain-JAX reference.
    C_ref = jnp.einsum("bmk,bkn->bmn", A, B)
    assert C.shape == (batch, m, n)
    assert jnp.allclose(C, C_ref, atol=1e-4, rtol=1e-4)

    print("KERNEL_OK")
</pallas_src>

<mosaic_0001>
module attributes {stable_mosaic.version = 11 : i64} {
  func.func @_bmm_kernel_single_k(%arg0: i32, %arg1: i32, %arg2: i32, %arg3: i32, %arg4: memref<2x64x32xf32, #tpu.memory_space<vmem>>, %arg5: memref<2x32x128xf32, #tpu.memory_space<vmem>>, %arg6: memref<2x64x128xf32, #tpu.memory_space<vmem>>) attributes {dimension_semantics = [#tpu.dimension_semantics<parallel>, #tpu.dimension_semantics<parallel>, #tpu.dimension_semantics<parallel>, #tpu.dimension_semantics<arbitrary>], iteration_bounds = array<i64: 1, 1, 1, 1>, scalar_prefetch = 0 : i64, scratch_operands = 0 : i64, tpu.core_type = #tpu.core_type<tc>, window_params = [{transform_indices = @transform_0, window_bounds = array<i64: 2, 64, 32>}, {transform_indices = @transform_1, window_bounds = array<i64: 2, 32, 128>}, {transform_indices = @transform_2, window_bounds = array<i64: 2, 64, 128>}]} {
    %c0 = arith.constant 0 : index
    %c0_0 = arith.constant 0 : index
    %c0_1 = arith.constant 0 : index
    %0 = vector.load %arg4[%c0, %c0_0, %c0_1] : memref<2x64x32xf32, #tpu.memory_space<vmem>>, vector<2x64x32xf32>
    %c0_2 = arith.constant 0 : index
    %c0_3 = arith.constant 0 : index
    %c0_4 = arith.constant 0 : index
    %1 = vector.load %arg5[%c0_2, %c0_3, %c0_4] : memref<2x32x128xf32, #tpu.memory_space<vmem>>, vector<2x32x128xf32>
    %cst = arith.constant dense<0.000000e+00> : vector<2x64x128xf32>
    %2 = tpu.matmul %0, %1, %cst {dimension_numbers = #tpu.dot_dimension_numbers<[2], [1], [1], [2], [0, 0, 0, 1, 1, 2], [0], [0]>} : vector<2x64x32xf32>, vector<2x32x128xf32>, vector<2x64x128xf32> -> vector<2x64x128xf32>
    %c0_5 = arith.constant 0 : index
    %c0_6 = arith.constant 0 : index
    %c0_7 = arith.constant 0 : index
    %3 = vector.load %arg6[%c0_5, %c0_6, %c0_7] : memref<2x64x128xf32, #tpu.memory_space<vmem>>, vector<2x64x128xf32>
    tpu.vector_store %arg6[%c0_5, %c0_6, %c0_7], %2 {strides = array<i32>} : memref<2x64x128xf32, #tpu.memory_space<vmem>>, vector<2x64x128xf32>,
    return
  }
  func.func @transform_0(%arg0: i32, %arg1: i32, %arg2: i32, %arg3: i32) -> (i32, i32, i32) {
    %c0_i32 = arith.constant 0 : i32
    return %arg0, %arg1, %arg3 : i32, i32, i32
  }
  func.func @transform_1(%arg0: i32, %arg1: i32, %arg2: i32, %arg3: i32) -> (i32, i32, i32) {
    %c0_i32 = arith.constant 0 : i32
    return %arg0, %arg3, %arg2 : i32, i32, i32
  }
  func.func @transform_2(%arg0: i32, %arg1: i32, %arg2: i32, %arg3: i32) -> (i32, i32, i32) {
    %c0_i32 = arith.constant 0 : i32
    return %arg0, %arg1, %arg2 : i32, i32, i32
  }
}

</mosaic_0001>

<bundles_post_ra>
// kernel: tpu_custom_call.1
= control target key start
LH: loop header
LB: loop body
LE: loop exit
PB: predicated region body
PF: predicated region fallthrough
CT: control target
= control target key end

     0   :  { %vm36_vm0 = vcmask 261120   ;;  %s568_s0 = inlined_call_operand.vmem [shape: f32[2,64,32], index: 0, kind: input, shape index: {}]   ;;  %s569_s1 = inlined_call_operand.vmem [shape: f32[2,32,128], index: 1, kind: input, shape index: {}]   ;;  %s570_s2 = inlined_call_operand.hbm [shape: f32[2,64,128], index: 2, kind: output, shape index: {}]  }
   0x1   :  { %v28_v0 = vld [vmem:[%s569_s1] sm:$0xff]  ;;  %v29_v1 = vld [vmem:[%s569_s1 + $0x8] sm:$0xff]  ;;  %v30_v5 = vld [vmem:[%s569_s1 + $0x10] sm:$0xff] }
   0x2   :  { %v32_v2 = vld [vmem:[%s569_s1 + $0x20] sm:$0xff]  ;;  %v407_v3 = vpack.c.bf16 %v29_v1, %v28_v0  ;;  %v33_v4 = vld [vmem:[%s569_s1 + $0x28] sm:$0xff]  ;;  %v31_v6 = vld [vmem:[%s569_s1 + $0x18] sm:$0xff] }
   0x3   :  { %v415_v7 = vpack.c.bf16 %v33_v4, %v32_v2  ;;  %v411_v8 = vpack.c.bf16 %v31_v6, %v30_v5  ;;  %v34_v9 = vld [vmem:[%s569_s1 + $0x30] sm:$0xff]  ;;  %v35_v10 = vld [vmem:[%s569_s1 + $0x38] sm:$0xff]  ;;  %v12_v11 = vld [vmem:[%s568_s0] sm:$0xff] }
   0x4   :  { %408 = vmatprep.subr.bf16.mxu0 %v407_v3  ;;  %v419_v12 = vpack.c.bf16 %v35_v10, %v34_v9  ;;  %375 = vmatprep.mubr.msk.f32.mxu0 %vm36_vm0, %v12_v11  ;;  %v20_v13 = vld [vmem:[%s568_s0 + $0x40] sm:$0xff]  ;;  %v13_v14 = vld [vmem:[%s568_s0 + $0x8] sm:$0xff] }
   0x5   :  { %416 = vmatprep.subr.bf16.mxu1 %v415_v7  ;;  %410 = vmatpush3.bf16.msra.mxu0 %v407_v3 }
   0x6   :  { %418 = vmatpush3.bf16.msra.mxu1 %v415_v7  ;;  %412 = vmatprep.subr.bf16.mxu0 %v411_v8 }
   0x7   :  { %420 = vmatprep.subr.bf16.mxu1 %v419_v12  ;;  %395 = vmatprep.mubr.msk.f32.mxu1 %vm36_vm0, %v20_v13 }
   0x9   :  { %414 = vmatpush3.bf16.msra.mxu0 %v411_v8 }
   0xa   :  { %7 = vsyncpa [#allocation3], 0  ;;  %422 = vmatpush3.bf16.msra.mxu1 %v419_v12  ;;  %v21_v15 = vld [vmem:[%s568_s0 + $0x48] sm:$0xff]  ;;  %v14_v16 = vld [vmem:[%s568_s0 + $0x10] sm:$0xff] }
   0xb   :  { %v22_v17 = vld [vmem:[%s568_s0 + $0x50] sm:$0xff]  ;;  %v15_v18 = vld [vmem:[%s568_s0 + $0x18] sm:$0xff]  ;;  %v16_v20 = vld [vmem:[%s568_s0 + $0x20] sm:$0xff] }
   0xc   :  { %376 = vmatmul.mubr.msk.f32.vlgmr.msra.gmra.mrb[0].mxu0 %vm36_vm0, %v13_v14  ;;  %v23_v19 = vld [vmem:[%s568_s0 + $0x58] sm:$0xff]  ;;  %v24_v21 = vld [vmem:[%s568_s0 + $0x60] sm:$0xff]  ;;  %v17_v22 = vld [vmem:[%s568_s0 + $0x28] sm:$0xff] }
   0xd   :  { %396 = vmatmul.mubr.msk.f32.vlgmr.msra.gmra.mrb[0].mxu1 %vm36_vm0, %v21_v15  ;;  %378 = vmatprep.mubr.msk.f32.mxu0 %vm36_vm0, %v14_v16  ;;  %v25_v23 = vld [vmem:[%s568_s0 + $0x68] sm:$0xff]  ;;  %v18_v24 = vld [vmem:[%s568_s0 + $0x30] sm:$0xff]  ;;  %v19_v26 = vld [vmem:[%s568_s0 + $0x38] sm:$0xff] }
   0xe   :  { %398 = vmatprep.mubr.msk.f32.mxu1 %vm36_vm0, %v22_v17  ;;  %v26_v25 = vld [vmem:[%s568_s0 + $0x70] sm:$0xff]  ;;  %v27_v27 = vld [vmem:[%s568_s0 + $0x78] sm:$0xff]  ;;  %s450_s0 = smov [#allocation2]  }
   0xf   :  { %s316_s28 = sshll.u32 %s450_s0, 4  ;;  %s317_s28 = int_to_ptr.vmem [resolvable:$true] %s316_s28 }
  0x10   :  { %379 = vmatmul.mubr.msk.f32.gmra.mrb[2].mxu0 %vm36_vm0, %v15_v18  ;;  %s426_s1 = scalar_lea.vmem %s317_s28, 2048  ;;  %p431_p1 = scmp.lt.s32.totalorder %s317_s28, %s317_s28 }
  0x11   :  { %399 = vmatmul.mubr.msk.f32.gmra.mrb[2].mxu1 %vm36_vm0, %v23_v19  ;;  %381 = vmatprep.mubr.msk.f32.mxu0 %vm36_vm0, %v16_v20  ;;  %p427_p0 = scmp.ne.s32.totalorder %s317_s28, %s426_s1  ;;  %p432_p2 = scmp.lt.s32.totalorder %s426_s1, %s426_s1 }
  0x12   :  { %401 = vmatprep.mubr.msk.f32.mxu1 %vm36_vm0, %v24_v21 }
  0x13   :  { %p433_p3 = por %p432_p2, %p431_p1 }
  0x14   :  { %382 = vmatmul.mubr.msk.f32.gmra.mrb[4].mxu0 %vm36_vm0, %v17_v22 }
  0x15   :  { %402 = vmatmul.mubr.msk.f32.gmra.mrb[4].mxu1 %vm36_vm0, %v25_v23  ;;  %384 = vmatprep.mubr.msk.f32.mxu0 %vm36_vm0, %v18_v24  ;;  %p434_p4 = pnand %p433_p3, %p427_p0 }
  0x16   :  { %404 = vmatprep.mubr.msk.f32.mxu1 %vm36_vm0, %v26_v25 }
  0x18   :  { %385 = vmatmul.mubr.msk.f32.gmra.mrb[6].mxu0 %vm36_vm0, %v19_v26 }
  0x19   :  { %405 = vmatmul.mubr.msk.f32.gmra.mrb[6].mxu1 %vm36_vm0, %v27_v27 }
  0xdf   :  { %v377_v28 = vpop.f32.mrb[0].mxu0 }
  0xe0   :  { %296 = vst [vmem:[#allocation2 + $0x8] sm:$0xff] %v377_v28  ;;  %v397_v29 = vpop.f32.mrb[0].mxu1  ;;  %v127_v30 = vpop.f32.mrb[1].mxu0 }
  0xe1   :  { %304 = vst [vmem:[#allocation2 + $0x48] sm:$0xff] %v397_v29  ;;  %295 = vst [vmem:[#allocation2] sm:$0xff] %v127_v30  ;;  %v256_v31 = vpop.f32.mrb[1].mxu1 }
  0xe2   :  { %303 = vst [vmem:[#allocation2 + $0x40] sm:$0xff] %v256_v31 }
  0xe3   :  { %v380_v32 = vpop.f32.mrb[2].mxu0 }
  0xe4   :  { %298 = vst [vmem:[#allocation2 + $0x18] sm:$0xff] %v380_v32  ;;  %v400_v33 = vpop.f32.mrb[2].mxu1  ;;  %v137_v34 = vpop.f32.mrb[3].mxu0 }
  0xe5   :  { %306 = vst [vmem:[#allocation2 + $0x58] sm:$0xff] %v400_v33  ;;  %297 = vst [vmem:[#allocation2 + $0x10] sm:$0xff] %v137_v34  ;;  %v266_v35 = vpop.f32.mrb[3].mxu1 }
  0xe6   :  { %305 = vst [vmem:[#allocation2 + $0x50] sm:$0xff] %v266_v35 }
  0xe7   :  { %v383_v36 = vpop.f32.mrb[4].mxu0 }
  0xe8   :  { %300 = vst [vmem:[#allocation2 + $0x28] sm:$0xff] %v383_v36  ;;  %v403_v37 = vpop.f32.mrb[4].mxu1  ;;  %v147_v38 = vpop.f32.mrb[5].mxu0 }
  0xe9   :  { %308 = vst [vmem:[#allocation2 + $0x68] sm:$0xff] %v403_v37  ;;  %299 = vst [vmem:[#allocation2 + $0x20] sm:$0xff] %v147_v38  ;;  %v276_v39 = vpop.f32.mrb[5].mxu1 }
  0xea   :  { %307 = vst [vmem:[#allocation2 + $0x60] sm:$0xff] %v276_v39 }
  0xeb   :  { %v386_v40 = vpop.f32.mrb[6].mxu0 }
  0xec   :  { %302 = vst [vmem:[#allocation2 + $0x38] sm:$0xff] %v386_v40  ;;  %v406_v41 = vpop.f32.mrb[6].mxu1  ;;  %v157_v42 = vpop.f32.mrb[7].mxu0 }
  0xed   :  { %310 = vst [vmem:[#allocation2 + $0x78] sm:$0xff] %v406_v41  ;;  %301 = vst [vmem:[#allocation2 + $0x30] sm:$0xff] %v157_v42  ;;  %v286_v43 = vpop.f32.mrb[7].mxu1 }
  0xee   :  { %309 = vst [vmem:[#allocation2 + $0x70] sm:$0xff] %v286_v43 }
  0xef   :  { %437 = shalt.err (!%p434_p4)
}
  0xf0   :  { %s438_s3 = scalar_lea.hbm %s570_s2, 2048 }
  0xf1   :  { %p439_p5 = scmp.ne.s32.totalorder %s570_s2, %s438_s3  ;;  %p442_p6 = scmp.lt.u32.totalorder %s438_s3, %s570_s2 }
  0xf3   :  { %p444_p7 = pnand %p442_p6, %p439_p5 }
  0xf5   :  { %447 = shalt.err (!%p444_p7)
}
  0xf6   :  { %s451_s8 = smov 128   ;;  %s452_s9 = smov 8  }
  0xf7   :  { %322 = dma.vmem_to_hbm [thread:$0]  %s317_s28, 2048, %s570_s2, [#allocation3], %s451_s8, %s451_s8, %s452_s9  }
  0xf8   :  { %448 = dma.done.wait [#allocation3], 2048  }
  0xf9   :  { %449 = vsyncadd [#allocation3], 4294965248 }
  0xfa   :  { %326 = vsyncpa [#allocation3], 1 }

</bundles_post_ra>
